<compile_context>
chip_gen: v7x
topology: tpu7x:2x2x1
jax: 0.10.0
libtpu: 0.0.40
codegen_flags: <defaults>
</compile_context>

<pallas_src>
import functools

import jax
import jax.numpy as jnp
from jax.experimental import pallas as pl
from jax.experimental.pallas import tpu as pltpu


def _pooler_kernel(x_ref, w_ref, b_ref, o_ref):
    # x_ref: (B, H)   pooled-token activations; constant block index -> fetched once
    # w_ref: (H, TN)  pre-transposed [in, out] weight strip (the HBM stream)
    # b_ref: (1, TN)  bias tile (tiny)
    # o_ref: (B, TN)  output tile
    x = x_ref[...]
    w = w_ref[...]
    if x.dtype != w.dtype:
        # Stream-dtype matmul (single-pass MXU for bf16); accumulation stays f32 below.
        x = x.astype(w.dtype)
    acc = jnp.dot(x, w, preferred_element_type=jnp.float32)
    o_ref[...] = jnp.tanh(acc + b_ref[...].astype(jnp.float32)).astype(o_ref.dtype)


def _pick_tn(h: int, w_itemsize: int, target_strip_bytes: int = 12 << 20) -> int:
    """Output (N) tile size for one (H, TN) weight strip.

    Preferences: TN divides H; multiple of 256 (v6e/v7x MXU; also a multiple of
    128 for v5e); one strip (H*TN*itemsize) stays near ~12 MiB so the
    double-buffered stream fits v7x's 64 MiB VMEM with room to spare; H/TN even
    and >= 2 so the "parallel" grid axis can shard across v7x's two TensorCores.
    """
    if h % 128 != 0:
        # Small / odd H: one full block.
        # TODO(synk): for LARGE H not divisible by 128, pad H to a multiple of
        # 128 instead of a full-H block (which would blow VMEM).
        return h
    step = 256 if h % 256 == 0 else 128
    divisors = [c for c in range(step, h + 1, step) if h % c == 0]
    fit = [c for c in divisors if h * c * w_itemsize <= target_strip_bytes]
    if not fit:
        fit = [divisors[0]]
    even = [c for c in fit if (h // c) >= 2 and (h // c) % 2 == 0]
    return max(even) if even else max(fit)


def init_pooler_params(weight, bias, *, stream_dtype=jnp.bfloat16):
    """One-time, OUTSIDE jit: relayout nn.Linear weight [out,in] -> [in,out] and
    cast to the streaming dtype (bf16 halves the HBM weight traffic that bounds
    this op).  The jitted pooler itself never transposes or re-casts.
    TODO(synk): int8 (v5e/v6e) / fp8 (v7x) weight paths with per-output-channel
    scales folded into the f32 epilogue before bias+tanh.
    """
    w_t = jnp.asarray(weight).T.astype(stream_dtype)
    return w_t, jnp.asarray(bias)


@functools.partial(jax.jit, static_argnames=("sequence_index",))
def pooler(hidden_states, w_t, bias, *, sequence_index: int = 0):
    """tanh(hidden_states[:, sequence_index, :] @ W.T + b).

    `w_t` must already be in [in, out] layout (see init_pooler_params); it may be
    stored in a narrower streaming dtype (bf16 recommended) — accumulation is f32.
    """
    B, S, H = hidden_states.shape
    assert w_t.shape == (H, H)
    assert bias.shape == (H,)
    assert 0 <= sequence_index < S

    # Pooled token as a contiguous (B, H) slab (tiny B*H copy) so the kernel sees
    # a plain 2-D block instead of a strided size-1-sequence 3-D fetch.
    pooled = hidden_states[:, sequence_index, :]

    w_itemsize = jnp.dtype(w_t.dtype).itemsize
    x_itemsize = jnp.dtype(pooled.dtype).itemsize
    b_itemsize = jnp.dtype(bias.dtype).itemsize

    TN = _pick_tn(H, w_itemsize)
    n_n = H // TN
    b2 = bias.reshape(1, H)

    grid_spec = pltpu.PrefetchScalarGridSpec(
        num_scalar_prefetch=0,
        grid=(n_n,),                                   # 1-D grid: N axis only (TK = H)
        in_specs=[
            pl.BlockSpec((B, H), lambda n: (0, 0)),    # x: constant index -> one fetch
            pl.BlockSpec((H, TN), lambda n: (0, n)),   # weight strip: the HBM stream
            pl.BlockSpec((1, TN), lambda n: (0, n)),   # bias tile
        ],
        out_specs=pl.BlockSpec((B, TN), lambda n: (0, n)),
    )

    # Explicit scoped-VMEM budget: 2x each pipelined block + headroom, clamped to
    # v7x's 64 MiB physical VMEM.
    pipelined = 2 * (H * TN * w_itemsize
                     + B * H * x_itemsize
                     + B * TN * x_itemsize
                     + TN * b_itemsize)
    vmem_limit = int(min(64 << 20, max(pipelined + (4 << 20), 32 << 20)))

    cost = pl.CostEstimate(
        flops=2 * B * H * H,
        transcendentals=B * H,                         # tanh
        bytes_accessed=(H * H * w_itemsize             # weight (dominant)
                        + B * H * x_itemsize           # pooled activations
                        + H * b_itemsize               # bias
                        + B * H * x_itemsize),         # output
    )

    return pl.pallas_call(
        _pooler_kernel,
        out_shape=jax.ShapeDtypeStruct((B, H), hidden_states.dtype),
        grid_spec=grid_spec,
        compiler_params=pltpu.CompilerParams(
            dimension_semantics=("parallel",),
            vmem_limit_bytes=vmem_limit,
        ),
        cost_estimate=cost,
    )(pooled, w_t, b2)


if __name__ == "__main__":
    batch, seq, hidden = 2, 8, 512
    key = jax.random.PRNGKey(0)
    k_h, k_w = jax.random.split(key)

    hidden_states = jax.random.normal(k_h, (batch, seq, hidden), dtype=jnp.float32)
    # Module __init__: Linear(H, H) weight from init_method, bias zeroed.
    weight = jax.random.normal(k_w, (hidden, hidden), dtype=jnp.float32) * 0.02
    bias = jnp.zeros((hidden,), dtype=jnp.float32)
    sequence_index = 0

    # Gold reference in full f32 precision.
    pooled_ref = hidden_states[:, sequence_index, :]
    ref = jnp.tanh(
        jax.lax.dot_general(pooled_ref, weight, (((1,), (1,)), ((), ())),
                            precision=jax.lax.Precision.HIGHEST) + bias)

    # f32 weight stream.
    w_t_f32, b_dev = init_pooler_params(weight, bias, stream_dtype=jnp.float32)
    out_f32 = jax.block_until_ready(
        pooler(hidden_states, w_t_f32, b_dev, sequence_index=sequence_index))
    assert out_f32.shape == (batch, hidden)
    assert jnp.allclose(out_f32, ref, atol=5e-3, rtol=0.0), \
        float(jnp.abs(out_f32 - ref).max())

    # bf16 weight stream (recommended deployment path: halves HBM weight bytes).
    w_t_bf16, _ = init_pooler_params(weight, bias, stream_dtype=jnp.bfloat16)
    out_bf16 = jax.block_until_ready(
        pooler(hidden_states, w_t_bf16, b_dev, sequence_index=sequence_index))
    assert out_bf16.shape == (batch, hidden)
    assert jnp.allclose(out_bf16, ref, atol=2e-2, rtol=0.0), \
        float(jnp.abs(out_bf16 - ref).max())

    print("KERNEL_OK")
</pallas_src>

<mosaic_0001>
module attributes {stable_mosaic.version = 11 : i64} {
  func.func @_pooler_kernel(%arg0: i32, %arg1: memref<2x512xf32, #tpu.memory_space<vmem>>, %arg2: memref<512x256xf32, #tpu.memory_space<vmem>>, %arg3: memref<1x256xf32, #tpu.memory_space<vmem>>, %arg4: memref<2x256xf32, #tpu.memory_space<vmem>>) attributes {dimension_semantics = [#tpu.dimension_semantics<parallel>], iteration_bounds = array<i64: 2>, scalar_prefetch = 0 : i64, scratch_operands = 0 : i64, tpu.core_type = #tpu.core_type<tc>, window_params = [{pipeline_mode = #tpu.pipeline_mode<synchronous>, transform_indices = @transform_0, window_bounds = array<i64: 2, 512>}, {transform_indices = @transform_1, window_bounds = array<i64: 512, 256>}, {transform_indices = @transform_2, window_bounds = array<i64: 1, 256>}, {transform_indices = @transform_3, window_bounds = array<i64: 2, 256>}]} {
    %c0 = arith.constant 0 : index
    %c0_0 = arith.constant 0 : index
    %0 = vector.load %arg1[%c0, %c0_0] : memref<2x512xf32, #tpu.memory_space<vmem>>, vector<2x512xf32>
    %c0_1 = arith.constant 0 : index
    %c0_2 = arith.constant 0 : index
    %1 = vector.load %arg2[%c0_1, %c0_2] : memref<512x256xf32, #tpu.memory_space<vmem>>, vector<512x256xf32>
    %cst = arith.constant dense<0.000000e+00> : vector<2x256xf32>
    %2 = tpu.matmul %0, %1, %cst {dimension_numbers = #tpu.dot_dimension_numbers<[1], [0], [0], [1], [0, 0, 1, 1], [], []>} : vector<2x512xf32>, vector<512x256xf32>, vector<2x256xf32> -> vector<2x256xf32>
    %c0_3 = arith.constant 0 : index
    %c0_4 = arith.constant 0 : index
    %3 = vector.load %arg3[%c0_3, %c0_4] : memref<1x256xf32, #tpu.memory_space<vmem>>, vector<1x256xf32>
    %4 = vector.broadcast %3 : vector<1x256xf32> to vector<2x256xf32>
    %5 = arith.addf %2, %4 : vector<2x256xf32>
    %6 = math.tanh %5 : vector<2x256xf32>
    %c0_5 = arith.constant 0 : index
    %c0_6 = arith.constant 0 : index
    %7 = vector.load %arg4[%c0_5, %c0_6] : memref<2x256xf32, #tpu.memory_space<vmem>>, vector<2x256xf32>
    tpu.vector_store %arg4[%c0_5, %c0_6], %6 {strides = array<i32>} : memref<2x256xf32, #tpu.memory_space<vmem>>, vector<2x256xf32>,
    return
  }
  func.func @transform_0(%arg0: i32) -> (i32, i32) {
    %c0_i32 = arith.constant 0 : i32
    %c0_i32_0 = arith.constant 0 : i32
    %c0_i32_1 = arith.constant 0 : i32
    return %c0_i32, %c0_i32_0 : i32, i32
  }
  func.func @transform_1(%arg0: i32) -> (i32, i32) {
    %c0_i32 = arith.constant 0 : i32
    %c0_i32_0 = arith.constant 0 : i32
    return %c0_i32, %arg0 : i32, i32
  }
  func.func @transform_2(%arg0: i32) -> (i32, i32) {
    %c0_i32 = arith.constant 0 : i32
    %c0_i32_0 = arith.constant 0 : i32
    return %c0_i32, %arg0 : i32, i32
  }
  func.func @transform_3(%arg0: i32) -> (i32, i32) {
    %c0_i32 = arith.constant 0 : i32
    %c0_i32_0 = arith.constant 0 : i32
    return %c0_i32, %arg0 : i32, i32
  }
}

</mosaic_0001>

<bundles_post_ra>
// kernel: pooler.1
= control target key start
LH: loop header
LB: loop body
LE: loop exit
PB: predicated region body
PF: predicated region fallthrough
CT: control target
= control target key end

     0   :  { %8 = vsyncpa [#allocation3], 0  ;;  %s1267_s0 = inlined_call_operand.vmem [shape: f32[2,512], index: 0, kind: input, shape index: {}]   ;;  %s1268_s1 = inlined_call_operand.hbm [shape: f32[512,512], index: 1, kind: input, shape index: {}]   ;;  %s1269_s2 = inlined_call_operand.vmem [shape: f32[1,512], index: 2, kind: input, shape index: {}]   ;;  %s1270_s3 = inlined_call_operand.hbm [shape: f32[2,512], index: 3, kind: output, shape index: {}]  }
   0x1   :  { %10 = vsyncpa [#allocation3 + $0x1], 0 }
   0x2   :  { %11 = vsyncpa [#allocation4], 0 }
   0x3   :  { %13 = vsyncpa [#allocation4 + $0x1], 0  ;;  %s952_s12 = smov 0   ;;  %s954_s13 = smov 0  }
   0x4   :  { %s956_s14 = smov 0   ;;  %s958_s15 = smov 0  }
   0x5 LB: > { %s973_s16 = sadd.s32 4294967295, %s924_s15   ;;  %s623_s17 = sadd.s32 4294967294, %s924_s15   ;;  %s924_s15 = sphi %s958_s15, %s1284_s15   ;;  %s920_s14 = sphi %s956_s14, %s1283_s14   ;;  %s916_s13 = sphi %s954_s13, %s1282_s13   ;;  %s912_s12 = sphi %s952_s12, %s1281_s12  }
   0x6   : > { %s977_s18 = sadd.s32 1, %s924_s15   ;;  %s47_s19 = sadd.s32 1, %s920_s14 }
   0x7   : > { %s44_s20 = ssub.s32 %s924_s15, %s977_s18  ;;  %p54_p0 = scmp.ne.s32.totalorder %s920_s14, %s916_s13 }
   0x8   : > { %p45_p1 = scmp.eq.s32.totalorder %s44_s20, 0  ;;  %p55_p2 = scmp.eq.s32.totalorder %s924_s15, 0 }
   0x9   : > { %p60_p3 = scmp.ne.s32.totalorder %s916_s13, %s912_s12  ;;  %p61_p4 = scmp.eq.s32.totalorder %s973_s16, 0 }
   0xa   : > { %s989_s21 = scalar_select %p45_p1, %s920_s14, %s47_s19  }
   0xb   : > { %p991_p5 = por %p55_p2, %p54_p0  ;;  %p995_p6 = por %p61_p4, %p60_p3 }
   0xc   : > { %p110_p7 = scmp.eq.s32.totalorder %s973_s16, 1  ;;  %p116_p8 = scmp.eq.s32.totalorder %s623_s17, 1 }
   0xd   : > { %p785_p10 = scmp.lt.s32.totalorder %s924_s15, 2  ;;  %s139_s26 = sand.u32 1, %s920_s14  }
   0xe   : > { %p1002_p11 = por %p110_p7, %p54_p0  ;;  %p1006_p12 = por %p116_p8, %p60_p3 }
   0xf   : > { %s639_s27 = sshll.u32 %s924_s15, 8  ;;  %s626_s28 = sshll.u32 %s139_s26, 10 }
  0x10   : > { %s1274_s24 = scalar_select %p1002_p11, 1, 0 }
  0x11   : > { %s1275_s25 = scalar_select %p1006_p12, 1, 0 }
  0x12   : > { %s1015_s4 = scalar_lea.hbm %s1268_s1, %s639_s27  ;;  %s143_s5 = scalar_lea.vmem [#allocation2], %s626_s28 }
  0x13   : > { %s150_s6 = sshll.u32 %s143_s5, 4  ;;  %p1019_p13 = pnand %p785_p10, %p991_p5  ;;  %s1023_s6 = int_to_ptr.vmem [resolvable:$true] %s150_s6 }
  0x14   : > { %s1026_s8 = scalar_lea.sflag [#allocation3], %s139_s26  ;;  %s828_s9 = scalar_lea.hbm %s1015_s4, 16384 }
  0x15   : > { %p829_p1 = scmp.ne.s32.totalorder %s1015_s4, %s828_s9  ;;  %p830_p2 = pneg %p1019_p13 }
  0x16   : > { %s833_s17 = scalar_lea.hbm %s1268_s1, 32768  ;;  %p834_p5 = scmp.lt.u32.totalorder %s1015_s4, %s1268_s1 }
  0x17   : > { %p831_p3 = pnand %p830_p2, %p829_p1  ;;  %p835_p7 = scmp.lt.u32.totalorder %s833_s17, %s828_s9 }
  0x18   : > { %p837_p10 = scmp.lt.u32.totalorder %s828_s9, %s1015_s4 }
  0x19   : > { %p832_p4 = pneg %p831_p3  ;;  %p836_p8 = por %p835_p7, %p834_p5 }
  0x1b   : > { %p838_p9 = por %p837_p10, %p836_p8 }
  0x1d   : > { %p839_p0 = pnand %p838_p9, %p832_p4 }
  0x1f   : > { %842 = shalt.err (!%p839_p0)
}
  0x20   : > { %s843_s22 = scalar_lea.vmem %s1023_s6, 16384  ;;  %s926_s26 = smov [#allocation2]  }
  0x21   : > { %p844_p1 = scmp.ne.s32.totalorder %s1023_s6, %s843_s22  ;;  %s848_s27 = sshll.u32 %s926_s26, 4  ;;  %s849_s27 = int_to_ptr.vmem [resolvable:$false] %s848_s27 }
  0x22   : > { %s850_s28 = scalar_lea.vmem %s849_s27, 32768  ;;  %p851_p11 = scmp.lt.s32.totalorder %s1023_s6, %s849_s27 }
  0x23   : > { %p846_p3 = pnand %p844_p1, %p830_p2  ;;  %p852_p5 = scmp.lt.s32.totalorder %s850_s28, %s843_s22 }
  0x25   : > { %p847_p12 = pneg %p846_p3  ;;  %p853_p7 = por %p852_p5, %p851_p11 }
  0x27   : > { %p854_p8 = pnand %p853_p7, %p847_p12 }
  0x29   : > { %857 = shalt.err (!%p854_p8)
}
  0x2a   : > { %s927_s29 = smov 512   ;;  %s928_s30 = smov 256  }
  0x2b   : > { %s929_s5 = smov 16   ;;  %p166_p9 = scmp.lt.s32.totalorder %s924_s15, 3 }
  0x2c   : > { %780 = dma.hbm_to_vmem [thread:$0]  (!%p1019_p13), %s1015_s4, 16384, %s1023_s6, %s1026_s8, %s927_s29, %s928_s30, %s929_s5  }
  0x2d   : > { %p1277_p0 = scmp.ge.s32.totalorder %s924_s15, 1 }
  0x2f   : > { %p167_p2 = pnand %p1277_p0, %p166_p9 }
  0x30   : > { %s1058_s9 = sand.u32 (!%p167_p2), 1, %s916_s13  }
  0x31   : > { %170 = sbr.rel (%p167_p2) target bundleno = 368 (0x170), region = 32  ;;  %s630_s10 = sshll.u32 (!%p167_p2), %s1058_s9, 10 }
  0x32   : > { %s173_s11 = scalar_lea.sflag (!%p167_p2), [#allocation3], %s1058_s9  ;;  %s1062_s17 = scalar_lea.vmem (!%p167_p2), [#allocation2], %s630_s10 }
  0x38   : > { %903 = dma.done.wait (%p995_p6), %s173_s11, 16384  }
  0x39   : > { %905 = vsyncadd (%p995_p6), %s173_s11, 4294950912  ;;  %v212_v0 = vld [vmem:[%s1062_s17 + $0x8] sm:$0xff]  ;;  %v214_v1 = vld [vmem:[%s1062_s17 + $0x18] sm:$0xff]  ;;  %s632_s6 = sshll.u32 %s973_s16, 1  ;;  %s631_s20 = sshll.u32 %s1058_s9, 2 }
  0x3a   : > { %v211_v2 = vld [vmem:[%s1062_s17] sm:$0xff]  ;;  %v641_v3 = vpack.c.bf16 %v214_v1, %v212_v0  ;;  %v213_v4 = vld [vmem:[%s1062_s17 + $0x10] sm:$0xff]  ;;  %v276_v5 = vld [vmem:[%s1062_s17 + $0x208] sm:$0xff]  ;;  %p205_p6 = scmp.lt.s32.totalorder %s632_s6, 3  ;;  %s640_s22 = sshll.u32 %s973_s16, 6 }
  0x3b   : > { %v278_v6 = vld [vmem:[%s1062_s17 + $0x218] sm:$0xff]  ;;  %v643_v7 = vpack.c.bf16 %v213_v4, %v211_v2  ;;  %v275_v9 = vld [vmem:[%s1062_s17 + $0x200] sm:$0xff]  ;;  %v277_v10 = vld [vmem:[%s1062_s17 + $0x210] sm:$0xff]  ;;  %s202_s26 = scalar_lea.vmem [#allocation5], %s631_s20  ;;  %s1223_s30 = scalar_lea.hbm %s1270_s3, %s640_s22 }
  0x3c   : > { %v705_v8 = vpack.c.bf16 %v278_v6, %v276_v5  ;;  %v216_v11 = vld [vmem:[%s1062_s17 + $0x28] sm:$0xff]  ;;  %642 = vmatprep.subr.bf16.mxu1 %v641_v3  ;;  %v707_v12 = vpack.c.bf16 %v277_v10, %v275_v9  ;;  %v218_v13 = vld [vmem:[%s1062_s17 + $0x38] sm:$0xff]  ;;  %v215_v14 = vld [vmem:[%s1062_s17 + $0x20] sm:$0xff]  ;;  %s1286_s6 = smov (!%p205_p6, %s632_s6), 3  ;;  %s544_s27 = sshll.u32 %s202_s26, 4  ;;  %s1225_s27 = int_to_ptr.vmem [resolvable:$true] %s544_s27 }
  0x3d   : > { %v217_v15 = vld [vmem:[%s1062_s17 + $0x30] sm:$0xff]  ;;  %644 = vmatpush1.bf16.msra.mxu1 %v643_v7  ;;  %v645_v16 = vpack.c.bf16 %v218_v13, %v216_v11  ;;  %v280_v18 = vld [vmem:[%s1062_s17 + $0x228] sm:$0xff]  ;;  %v282_v19 = vld [vmem:[%s1062_s17 + $0x238] sm:$0xff]  ;;  %s207_s19 = scalar_lea.vmem %s1269_s2, %s1286_s6  ;;  %s530_s5 = scalar_lea.sflag [#allocation4], %s1058_s9 }
  0x3e   : > { %706 = vmatprep.subr.bf16.mxu0 %v705_v8  ;;  %v647_v17 = vpack.c.bf16 %v217_v15, %v215_v14  ;;  %v279_v20 = vld [vmem:[%s1062_s17 + $0x220] sm:$0xff]  ;;  %v709_v21 = vpack.c.bf16 %v282_v19, %v280_v18  ;;  %v281_v22 = vld [vmem:[%s1062_s17 + $0x230] sm:$0xff]  ;;  %v220_v23 = vld [vmem:[%s1062_s17 + $0x48] sm:$0xff]  ;;  %s858_s10 = scalar_lea.vmem %s1225_s27, 64  ;;  %p1278_p12 = scmp.ne.s32.totalorder %s1274_s24, 0 }
  0x3f   : > { %708 = vmatpush1.bf16.msra.mxu0 %v707_v12  ;;  %v222_v24 = vld [vmem:[%s1062_s17 + $0x58] sm:$0xff]  ;;  %646 = vmatprep.subr.bf16.mxu1 %v645_v16  ;;  %v711_v25 = vpack.c.bf16 %v281_v22, %v279_v20  ;;  %v219_v27 = vld [vmem:[%s1062_s17 + $0x40] sm:$0xff]  ;;  %v221_v28 = vld [vmem:[%s1062_s17 + $0x50] sm:$0xff]  ;;  %p859_p11 = scmp.ne.s32.totalorder %s1225_s27, %s858_s10  ;;  %s931_s16 = smov [#allocation5]  }
  0x40   : > { %v649_v26 = vpack.c.bf16 %v222_v24, %v220_v23  ;;  %v284_v29 = vld [vmem:[%s1062_s17 + $0x248] sm:$0xff]  ;;  %710 = vmatprep.subr.bf16.mxu0 %v709_v21  ;;  %v286_v30 = vld [vmem:[%s1062_s17 + $0x258] sm:$0xff]  ;;  %v283_v31 = vld [vmem:[%s1062_s17 + $0x240] sm:$0xff]  ;;  %v651_v33 = vpack.c.bf16 %v221_v28, %v219_v27  ;;  %s862_s11 = sshll.u32 %s931_s16, 4  ;;  %s863_s11 = int_to_ptr.vmem [resolvable:$false] %s862_s11 }
  0x41   : > { %v285_v32 = vld [vmem:[%s1062_s17 + $0x250] sm:$0xff]  ;;  %648 = vmatpush1.bf16.msra.mxu1 %v647_v17  ;;  %v713_v34 = vpack.c.bf16 %v286_v30, %v284_v29  ;;  %v224_v35 = vld [vmem:[%s1062_s17 + $0x68] sm:$0xff]  ;;  %v226_v36 = vld [vmem:[%s1062_s17 + $0x78] sm:$0xff]  ;;  %p860_p13 = pnand %p859_p11, %p1278_p12  ;;  %p865_p10 = scmp.lt.s32.totalorder %s1225_s27, %s863_s11 }
  0x42   : > { %v223_v37 = vld [vmem:[%s1062_s17 + $0x60] sm:$0xff]  ;;  %650 = vmatprep.subr.bf16.mxu1 %v649_v26  ;;  %v715_v38 = vpack.c.bf16 %v285_v32, %v283_v31  ;;  %v653_v39 = vpack.c.bf16 %v226_v36, %v224_v35  ;;  %v225_v40 = vld [vmem:[%s1062_s17 + $0x70] sm:$0xff]  ;;  %v288_v41 = vld [vmem:[%s1062_s17 + $0x268] sm:$0xff] }
  0x43   : > { %712 = vmatpush1.bf16.msra.mxu0 %v711_v25  ;;  %v290_v42 = vld [vmem:[%s1062_s17 + $0x278] sm:$0xff]  ;;  %v287_v44 = vld [vmem:[%s1062_s17 + $0x260] sm:$0xff]  ;;  %v289_v45 = vld [vmem:[%s1062_s17 + $0x270] sm:$0xff]  ;;  %v655_v48 = vpack.c.bf16 %v225_v40, %v223_v37  ;;  %p861_p4 = pneg %p860_p13 }
  0x44   : > { %714 = vmatprep.subr.bf16.mxu0 %v713_v34  ;;  %v717_v43 = vpack.c.bf16 %v290_v42, %v288_v41  ;;  %v228_v46 = vld [vmem:[%s1062_s17 + $0x88] sm:$0xff]  ;;  %v230_v47 = vld [vmem:[%s1062_s17 + $0x98] sm:$0xff]  ;;  %v719_v51 = vpack.c.bf16 %v289_v45, %v287_v44  ;;  %v227_v53 = vld [vmem:[%s1062_s17 + $0x80] sm:$0xff] }
  0x45   : > { %652 = vmatpush1.bf16.msra.mxu1 %v651_v33  ;;  %v292_v49 = vld [vmem:[%s1062_s17 + $0x288] sm:$0xff]  ;;  %v294_v50 = vld [vmem:[%s1062_s17 + $0x298] sm:$0xff]  ;;  %v657_v52 = vpack.c.bf16 %v230_v47, %v228_v46  ;;  %v229_v54 = vld [vmem:[%s1062_s17 + $0x90] sm:$0xff]  ;;  %v341_v46 = vlaneseq  ;;  %v930_v47 = vmov 1983009808  }
  0x46   : > { %654 = vmatprep.subr.bf16.mxu1 %v653_v39  ;;  %v291_v55 = vld [vmem:[%s1062_s17 + $0x280] sm:$0xff]  ;;  %v721_v56 = vpack.c.bf16 %v294_v50, %v292_v49  ;;  %v293_v57 = vld [vmem:[%s1062_s17 + $0x290] sm:$0xff]  ;;  %v232_v58 = vld [vmem:[%s1062_s17 + $0xa8] sm:$0xff]  ;;  %v659_v62 = vpack.c.bf16 %v229_v54, %v227_v53 }
  0x47   : > { %716 = vmatpush1.bf16.msra.mxu0 %v715_v38  ;;  %v234_v59 = vld [vmem:[%s1062_s17 + $0xb8] sm:$0xff]  ;;  %v296_v60 = vld [vmem:[%s1062_s17 + $0x2a8] sm:$0xff]  ;;  %v723_v63 = vpack.c.bf16 %v293_v57, %v291_v55  ;;  %v231_v1 = vld [vmem:[%s1062_s17 + $0xa0] sm:$0xff] }
  0x48   : > { %718 = vmatprep.subr.bf16.mxu0 %v717_v43  ;;  %v298_v61 = vld [vmem:[%s1062_s17 + $0x2b8] sm:$0xff]  ;;  %v661_v0 = vpack.c.bf16 %v234_v59, %v232_v58  ;;  %v233_v2 = vld [vmem:[%s1062_s17 + $0xb0] sm:$0xff]  ;;  %v295_v3 = vld [vmem:[%s1062_s17 + $0x2a0] sm:$0xff] }
  0x49   : > { %656 = vmatpush1.bf16.msra.mxu1 %v655_v48  ;;  %v725_v4 = vpack.c.bf16 %v298_v61, %v296_v60  ;;  %v297_v5 = vld [vmem:[%s1062_s17 + $0x2b0] sm:$0xff]  ;;  %v236_v6 = vld [vmem:[%s1062_s17 + $0xc8] sm:$0xff]  ;;  %v238_v7 = vld [vmem:[%s1062_s17 + $0xd8] sm:$0xff]  ;;  %v663_v10 = vpack.c.bf16 %v233_v2, %v231_v1  ;;  %v354_v48 = vunpack.c.l.s4 %v930_v47  ;;  %v1152_v61 = vshrl.u32 %v341_v46, 7 }
  0x4a   : > { %658 = vmatprep.subr.bf16.mxu1 %v657_v52  ;;  %v300_v8 = vld [vmem:[%s1062_s17 + $0x2c8] sm:$0xff]  ;;  %v302_v9 = vld [vmem:[%s1062_s17 + $0x2d8] sm:$0xff]  ;;  %v727_v11 = vpack.c.bf16 %v297_v5, %v295_v3  ;;  %v665_v12 = vpack.c.bf16 %v238_v7, %v236_v6  ;;  %v235_v13 = vld [vmem:[%s1062_s17 + $0xc0] sm:$0xff] }
  0x4b   : > { %720 = vmatpush1.bf16.msra.mxu0 %v719_v51  ;;  %v237_v14 = vld [vmem:[%s1062_s17 + $0xd0] sm:$0xff]  ;;  %v299_v15 = vld [vmem:[%s1062_s17 + $0x2c0] sm:$0xff]  ;;  %v729_v16 = vpack.c.bf16 %v302_v9, %v300_v8  ;;  %v240_v18 = vld [vmem:[%s1062_s17 + $0xe8] sm:$0xff] }
  0x4c   : > { %722 = vmatprep.subr.bf16.mxu0 %v721_v56  ;;  %v301_v17 = vld [vmem:[%s1062_s17 + $0x2d0] sm:$0xff]  ;;  %v242_v19 = vld [vmem:[%s1062_s17 + $0xf8] sm:$0xff]  ;;  %v304_v20 = vld [vmem:[%s1062_s17 + $0x2e8] sm:$0xff]  ;;  %v667_v22 = vpack.c.bf16 %v237_v14, %v235_v13 }
  0x4d   : > { %660 = vmatpush1.bf16.msra.mxu1 %v659_v62  ;;  %v306_v21 = vld [vmem:[%s1062_s17 + $0x2f8] sm:$0xff]  ;;  %v731_v23 = vpack.c.bf16 %v301_v17, %v299_v15  ;;  %v669_v24 = vpack.c.bf16 %v242_v19, %v240_v18  ;;  %v239_v25 = vld [vmem:[%s1062_s17 + $0xe0] sm:$0xff]  ;;  %v241_v26 = vld [vmem:[%s1062_s17 + $0xf0] sm:$0xff]  ;;  %v355_v62 = vunpack.c.0.s8 %v354_v48 }
  0x4e   : > { %662 = vmatprep.subr.bf16.mxu1 %v661_v0  ;;  %v303_v27 = vld [vmem:[%s1062_s17 + $0x2e0] sm:$0xff]  ;;  %v733_v28 = vpack.c.bf16 %v306_v21, %v304_v20  ;;  %v305_v29 = vld [vmem:[%s1062_s17 + $0x2f0] sm:$0xff]  ;;  %v244_v30 = vld [vmem:[%s1062_s17 + $0x108] sm:$0xff]  ;;  %v671_v34 = vpack.c.bf16 %v241_v26, %v239_v25 }
  0x4f   : > { %724 = vmatpush1.bf16.msra.mxu0 %v723_v63  ;;  %v246_v31 = vld [vmem:[%s1062_s17 + $0x118] sm:$0xff]  ;;  %v308_v32 = vld [vmem:[%s1062_s17 + $0x308] sm:$0xff]  ;;  %v735_v35 = vpack.c.bf16 %v305_v29, %v303_v27  ;;  %v243_v37 = vld [vmem:[%s1062_s17 + $0x100] sm:$0xff] }
  0x50   : > { %726 = vmatprep.subr.bf16.mxu0 %v725_v4  ;;  %v310_v33 = vld [vmem:[%s1062_s17 + $0x318] sm:$0xff]  ;;  %v673_v36 = vpack.c.bf16 %v246_v31, %v244_v30  ;;  %v245_v38 = vld [vmem:[%s1062_s17 + $0x110] sm:$0xff]  ;;  %v307_v39 = vld [vmem:[%s1062_s17 + $0x300] sm:$0xff] }
  0x51   : > { %664 = vmatpush1.bf16.msra.mxu1 %v663_v10  ;;  %v737_v40 = vpack.c.bf16 %v310_v33, %v308_v32  ;;  %v309_v41 = vld [vmem:[%s1062_s17 + $0x310] sm:$0xff]  ;;  %v248_v42 = vld [vmem:[%s1062_s17 + $0x128] sm:$0xff]  ;;  %v250_v43 = vld [vmem:[%s1062_s17 + $0x138] sm:$0xff]  ;;  %v675_v49 = vpack.c.bf16 %v245_v38, %v243_v37 }
  0x52   : > { %666 = vmatprep.subr.bf16.mxu1 %v665_v12  ;;  %v312_v44 = vld [vmem:[%s1062_s17 + $0x328] sm:$0xff]  ;;  %v314_v45 = vld [vmem:[%s1062_s17 + $0x338] sm:$0xff]  ;;  %v739_v50 = vpack.c.bf16 %v309_v41, %v307_v39  ;;  %v677_v51 = vpack.c.bf16 %v250_v43, %v248_v42  ;;  %v247_v52 = vld [vmem:[%s1062_s17 + $0x120] sm:$0xff] }
  0x53   : > { %728 = vmatpush1.bf16.msra.mxu0 %v727_v11  ;;  %v249_v53 = vld [vmem:[%s1062_s17 + $0x130] sm:$0xff]  ;;  %v311_v54 = vld [vmem:[%s1062_s17 + $0x320] sm:$0xff]  ;;  %v741_v55 = vpack.c.bf16 %v314_v45, %v312_v44  ;;  %v252_v57 = vld [vmem:[%s1062_s17 + $0x148] sm:$0xff]  ;;  %v358_v11 = vsub.s32 %v355_v62, %v1152_v61 }
  0x54   : > { %730 = vmatprep.subr.bf16.mxu0 %v729_v16  ;;  %v313_v56 = vld [vmem:[%s1062_s17 + $0x330] sm:$0xff]  ;;  %v254_v58 = vld [vmem:[%s1062_s17 + $0x158] sm:$0xff]  ;;  %v316_v59 = vld [vmem:[%s1062_s17 + $0x348] sm:$0xff]  ;;  %v679_v63 = vpack.c.bf16 %v249_v53, %v247_v52 }
  0x55   : > { %668 = vmatpush1.bf16.msra.mxu1 %v667_v22  ;;  %v318_v60 = vld [vmem:[%s1062_s17 + $0x358] sm:$0xff]  ;;  %v743_v0 = vpack.c.bf16 %v313_v56, %v311_v54  ;;  %v681_v1 = vpack.c.bf16 %v254_v58, %v252_v57  ;;  %v251_v2 = vld [vmem:[%s1062_s17 + $0x140] sm:$0xff]  ;;  %v253_v3 = vld [vmem:[%s1062_s17 + $0x150] sm:$0xff] }
  0x56   : > { %670 = vmatprep.subr.bf16.mxu1 %v669_v24  ;;  %v315_v4 = vld [vmem:[%s1062_s17 + $0x340] sm:$0xff]  ;;  %v745_v5 = vpack.c.bf16 %v318_v60, %v316_v59  ;;  %v317_v6 = vld [vmem:[%s1062_s17 + $0x350] sm:$0xff]  ;;  %v256_v7 = vld [vmem:[%s1062_s17 + $0x168] sm:$0xff]  ;;  %v683_v12 = vpack.c.bf16 %v253_v3, %v251_v2 }
  0x57   : > { %732 = vmatpush1.bf16.msra.mxu0 %v731_v23  ;;  %v258_v8 = vld [vmem:[%s1062_s17 + $0x178] sm:$0xff]  ;;  %v320_v9 = vld [vmem:[%s1062_s17 + $0x368] sm:$0xff]  ;;  %v255_v13 = vld [vmem:[%s1062_s17 + $0x160] sm:$0xff]  ;;  %v747_v14 = vpack.c.bf16 %v317_v6, %v315_v4 }
  0x58   : > { %734 = vmatprep.subr.bf16.mxu0 %v733_v28  ;;  %v322_v10 = vld [vmem:[%s1062_s17 + $0x378] sm:$0xff]  ;;  %v685_v15 = vpack.c.bf16 %v258_v8, %v256_v7  ;;  %v257_v16 = vld [vmem:[%s1062_s17 + $0x170] sm:$0xff]  ;;  %v319_v17 = vld [vmem:[%s1062_s17 + $0x360] sm:$0xff] }
  0x59   : > { %672 = vmatpush1.bf16.msra.mxu1 %v671_v34  ;;  %v321_v18 = vld [vmem:[%s1062_s17 + $0x370] sm:$0xff]  ;;  %v749_v19 = vpack.c.bf16 %v322_v10, %v320_v9  ;;  %v260_v20 = vld [vmem:[%s1062_s17 + $0x188] sm:$0xff]  ;;  %v262_v21 = vld [vmem:[%s1062_s17 + $0x198] sm:$0xff]  ;;  %v687_v27 = vpack.c.bf16 %v257_v16, %v255_v13  ;;  %v343_v13 = vsub.s32 0, %v1152_v61 }
  0x5a   : > { %674 = vmatprep.subr.bf16.mxu1 %v673_v36  ;;  %v210_v22 = vld [vmem:[%s1267_s0] sm:$0xff]  ;;  %v324_v23 = vld [vmem:[%s1062_s17 + $0x388] sm:$0xff]  ;;  %v326_v24 = vld [vmem:[%s1062_s17 + $0x398] sm:$0xff]  ;;  %v751_v28 = vpack.c.bf16 %v321_v18, %v319_v17  ;;  %v689_v29 = vpack.c.bf16 %v262_v21, %v260_v20 }
  0x5b   : > { %736 = vmatpush1.bf16.msra.mxu0 %v735_v35  ;;  %v1174_v25 = vrot.slane %v210_v22, %v358_v11  ;;  %v352_v26 = vcombine.high %v210_v22, %v210_v22  ;;  %v259_v30 = vld [vmem:[%s1062_s17 + $0x180] sm:$0xff]  ;;  %v261_v31 = vld [vmem:[%s1062_s17 + $0x190] sm:$0xff]  ;;  %v753_v35 = vpack.c.bf16 %v326_v24, %v324_v23  ;;  %v264_v37 = vld [vmem:[%s1062_s17 + $0x1a8] sm:$0xff] }
  0x5c   : > { %738 = vmatprep.subr.bf16.mxu0 %v737_v40  ;;  %v323_v32 = vld [vmem:[%s1062_s17 + $0x380] sm:$0xff]  ;;  %v325_v36 = vld [vmem:[%s1062_s17 + $0x390] sm:$0xff]  ;;  %v266_v38 = vld [vmem:[%s1062_s17 + $0x1b8] sm:$0xff]  ;;  %v691_v42 = vpack.c.bf16 %v261_v31, %v259_v30 }
  0x5d   : > { %676 = vmatpush1.bf16.msra.mxu1 %v675_v49  ;;  %v367_v33 = vcombine.high %v1174_v25, %v1174_v25  ;;  %v1181_v34 = vrot.slane %v352_v26, %v358_v11  ;;  %v328_v39 = vld [vmem:[%s1062_s17 + $0x3a8] sm:$0xff]  ;;  %v330_v40 = vld [vmem:[%s1062_s17 + $0x3b8] sm:$0xff]  ;;  %v755_v43 = vpack.c.bf16 %v325_v36, %v323_v32  ;;  %v693_v44 = vpack.c.bf16 %v266_v38, %v264_v37  ;;  %v263_v45 = vld [vmem:[%s1062_s17 + $0x1a0] sm:$0xff] }
  0x5e   : > { %678 = vmatprep.subr.bf16.mxu1 %v677_v51  ;;  %v265_v46 = vld [vmem:[%s1062_s17 + $0x1b0] sm:$0xff]  ;;  %v327_v47 = vld [vmem:[%s1062_s17 + $0x3a0] sm:$0xff]  ;;  %v757_v48 = vpack.c.bf16 %v330_v40, %v328_v39  ;;  %v270_v51 = vld [vmem:[%s1062_s17 + $0x1d8] sm:$0xff] }
  0x5f   : > { %740 = vmatpush1.bf16.msra.mxu0 %v739_v50  ;;  %437 = vmatprep.mubr.f32.mxu1 %v367_v33  ;;  %v368_v41 = vcombine.high %v1181_v34, %v1181_v34  ;;  %v329_v49 = vld [vmem:[%s1062_s17 + $0x3b0] sm:$0xff]  ;;  %v268_v50 = vld [vmem:[%s1062_s17 + $0x1c8] sm:$0xff]  ;;  %v334_v53 = vld [vmem:[%s1062_s17 + $0x3d8] sm:$0xff]  ;;  %v695_v54 = vpack.c.bf16 %v265_v46, %v263_v45 }
  0x60   : > { %742 = vmatprep.subr.bf16.mxu0 %v741_v55  ;;  %v332_v52 = vld [vmem:[%s1062_s17 + $0x3c8] sm:$0xff]  ;;  %v759_v55 = vpack.c.bf16 %v329_v49, %v327_v47  ;;  %v697_v56 = vpack.c.bf16 %v270_v51, %v268_v50  ;;  %v267_v57 = vld [vmem:[%s1062_s17 + $0x1c0] sm:$0xff]  ;;  %v269_v58 = vld [vmem:[%s1062_s17 + $0x1d0] sm:$0xff] }
  0x61   : > { %680 = vmatpush1.bf16.msra.mxu1 %v679_v63  ;;  %508 = vmatprep.mubr.f32.mxu0 %v368_v41  ;;  %v331_v59 = vld [vmem:[%s1062_s17 + $0x3c0] sm:$0xff]  ;;  %v761_v60 = vpack.c.bf16 %v334_v53, %v332_v52  ;;  %v333_v62 = vld [vmem:[%s1062_s17 + $0x3d0] sm:$0xff]  ;;  %v272_v63 = vld [vmem:[%s1062_s17 + $0x1e8] sm:$0xff]  ;;  %v699_v3 = vpack.c.bf16 %v269_v58, %v267_v57 }
  0x62   : > { %682 = vmatprep.subr.bf16.mxu1 %v681_v1  ;;  %v336_v1 = vld [vmem:[%s1062_s17 + $0x3e8] sm:$0xff]  ;;  %v338_v2 = vld [vmem:[%s1062_s17 + $0x3f8] sm:$0xff]  ;;  %v763_v4 = vpack.c.bf16 %v333_v62, %v331_v59  ;;  %v271_v6 = vld [vmem:[%s1062_s17 + $0x1e0] sm:$0xff] }
  0x63   : > { %744 = vmatpush1.bf16.msra.mxu0 %v743_v0  ;;  %v274_v0 = vld [vmem:[%s1062_s17 + $0x1f8] sm:$0xff]  ;;  %v273_v7 = vld [vmem:[%s1062_s17 + $0x1f0] sm:$0xff]  ;;  %v765_v8 = vpack.c.bf16 %v338_v2, %v336_v1  ;;  %v335_v9 = vld [vmem:[%s1062_s17 + $0x3e0] sm:$0xff] }
  0x64   : > { %746 = vmatprep.subr.bf16.mxu0 %v745_v5  ;;  %v701_v5 = vpack.c.bf16 %v274_v0, %v272_v63  ;;  %v337_v10 = vld [vmem:[%s1062_s17 + $0x3f0] sm:$0xff]  ;;  %v703_v11 = vpack.c.bf16 %v273_v7, %v271_v6  ;;  %s864_s17 = scalar_lea.vmem %s863_s11, 128 }
  0x65   : > { %684 = vmatpush1.bf16.msra.mxu1 %v683_v12  ;;  %v767_v12 = vpack.c.bf16 %v337_v10, %v335_v9  ;;  %p866_p1 = scmp.lt.s32.totalorder %s864_s17, %s858_s10 }
  0x66   : > { %686 = vmatprep.subr.bf16.mxu1 %v685_v15  ;;  %v347_v15 = vsub.s32 1, %v1152_v61 }
  0x67   : > { %748 = vmatpush1.bf16.msra.mxu0 %v747_v14  ;;  %v339_v14 = vld [vmem:[%s207_s19] sm:$0x3]  ;;  %p867_p3 = por %p866_p1, %p865_p10 }
  0x68   : > { %750 = vmatprep.subr.bf16.mxu0 %v749_v19  ;;  %v344_v16 = vrot.slane %v339_v14, %v343_v13  ;;  %v348_v17 = vrot.slane %v339_v14, %v347_v15 }
  0x69   : > { %688 = vmatpush1.bf16.msra.mxu1 %v687_v27  ;;  %p868_p5 = pnand %p867_p3, %p861_p4 }
  0x6a   : > { %690 = vmatprep.subr.bf16.mxu1 %v689_v29 }
  0x6b   : > { %752 = vmatpush1.bf16.msra.mxu0 %v751_v28 }
  0x6c   : > { %754 = vmatprep.subr.bf16.mxu0 %v753_v35 }
  0x6d   : > { %692 = vmatpush1.bf16.msra.mxu1 %v691_v42 }
  0x6e   : > { %694 = vmatprep.subr.bf16.mxu1 %v693_v44 }
  0x6f   : > { %756 = vmatpush1.bf16.msra.mxu0 %v755_v43 }
  0x70   : > { %758 = vmatprep.subr.bf16.mxu0 %v757_v48 }
  0x71   : > { %696 = vmatpush1.bf16.msra.mxu1 %v695_v54 }
  0x72   : > { %698 = vmatprep.subr.bf16.mxu1 %v697_v56 }
  0x73   : > { %760 = vmatpush1.bf16.msra.mxu0 %v759_v55 }
  0x74   : > { %762 = vmatprep.subr.bf16.mxu0 %v761_v60 }
  0x75   : > { %700 = vmatpush1.bf16.msra.mxu1 %v699_v3 }
  0x76   : > { %702 = vmatprep.subr.bf16.mxu1 %v701_v5 }
  0x77   : > { %764 = vmatpush1.bf16.msra.mxu0 %v763_v4 }
  0x78   : > { %766 = vmatprep.subr.bf16.mxu0 %v765_v8 }
  0x79   : > { %704 = vmatpush1.bf16.msra.mxu1 %v703_v11 }
  0x7b   : > { %768 = vmatpush1.bf16.msra.mxu0 %v767_v12 }
  0x7c   : > { %438 = vmatmul.mubr.f32.vlgmr.msra.gmra.mrb[0].mxu1 %v1174_v25 }
  0x7e   : > { %509 = vmatmul.mubr.f32.vlgmr.msra.gmra.mrb[0].mxu0 %v1181_v34 }
 0x14f   : > { %v439_v18 = vpop.f32.mrb[0].mxu1 }
 0x150   : > { %v440_v19 = vadd.f32 %v439_v18, %v344_v16  ;;  %v441_v20 = vpop.f32.mrb[1].mxu1 }
 0x151   : > { %v510_v21 = vpop.f32.mrb[0].mxu0  ;;  %v442_v22 = vadd.f32 %v441_v20, %v348_v17 }
 0x152   : > { %v512_v23 = vpop.f32.mrb[1].mxu0  ;;  %v511_v24 = vadd.f32 %v510_v21, %v440_v19 }
 0x153   : > { %v513_v25 = vadd.f32 %v512_v23, %v442_v22 }
 0x154   : > { %824 = vtanh.f32 %v511_v24 }
 0x155   : > { %826 = vtanh.f32 %v513_v25 }
 0x15e   : > { %v825_v26 = vpop.eup %824 }
 0x15f   : > { %v827_v61 = vpop.eup %826 }
 0x160   : > { %v519_v27 = vcombine.low %v825_v26, %v827_v61 }
 0x162   : > { %633 = vst.sshfl [vmem:[%s202_s26] sm:$0x33 pattern:$0x76325410] %v519_v27 }
 0x163   : > { %871 = shalt.err (!%p868_p5)
}
 0x164   : > { %s872_s9 = scalar_lea.hbm %s1223_s30, 64  ;;  %s876_s6 = scalar_lea.hbm %s1270_s3, 128 }
 0x165   : > { %p873_p7 = scmp.ne.s32.totalorder %s1223_s30, %s872_s9  ;;  %p877_p0 = scmp.lt.u32.totalorder %s1223_s30, %s1270_s3 }
 0x166   : > { %p878_p2 = scmp.lt.u32.totalorder %s876_s6, %s872_s9  ;;  %p880_p11 = scmp.lt.u32.totalorder %s872_s9, %s1223_s30 }
 0x167   : > { %p874_p8 = pnand %p873_p7, %p1278_p12 }
 0x168   : > { %p879_p6 = por %p878_p2, %p877_p0 }
 0x169   : > { %p875_p9 = pneg %p874_p8 }
 0x16a   : > { %p881_p13 = por %p880_p11, %p879_p6 }
 0x16c   : > { %p882_p4 = pnand %p881_p13, %p875_p9 }
 0x16e   : > { %885 = shalt.err (!%p882_p4)
}
 0x16f   : > { %775 = dma.vmem_to_hbm [thread:$0]  (%p1278_p12), %s1225_s27, 64, %s1223_s30, %s530_s5  }
 0x170 PF: > { %s556_s19 = sand.u32 1, %s912_s12   ;;  %p1279_p10 = scmp.ne.s32.totalorder %s1275_s25, 0 }
 0x171   : > { %p1280_p1 = scmp.ge.s32.totalorder %s924_s15, 2  ;;  %s557_s20 = scalar_lea.sflag [#allocation4], %s556_s19 }
 0x173   : > { %p782_p3 = pnand %p1280_p1, %p1279_p10 }
 0x175   : > { %907 = dma.done.wait (!%p782_p3), %s557_s20, 64  }
 0x176   : > { %909 = vsyncadd (!%p782_p3), %s557_s20, 4294967232  ;;  %p16_p5 = scmp.ge.s32.totalorder %s977_s18, 4   ;;  %s1281_s12 = smov %s916_s13 }
 0x177   : > { %s1282_s13 = smov %s920_s14  ;;  %s1283_s14 = smov %s989_s21 }
 0x178   : > { %s1284_s15 = smov %s977_s18  ;;  %18 = sbr.rel (!%p16_p5) target bundleno = 5 (0x5), region = 80 }
 0x17f   :  { %562 = vsyncpa [#allocation3], 1 }
 0x180   :  { %564 = vsyncpa [#allocation3 + $0x1], 1 }
 0x181   :  { %565 = vsyncpa [#allocation4], 1 }
 0x182   :  { %567 = vsyncpa [#allocation4 + $0x1], 1 }

</bundles_post_ra>
